<compile_context>
chip_gen: v7x
topology: tpu7x:2x2x1
jax: 0.10.0
libtpu: 0.0.40
codegen_flags: <defaults>
</compile_context>

<pallas_src>
import jax
import jax.numpy as jnp
from jax.experimental import pallas as pl
from jax.experimental.pallas import tpu as pltpu

# ---------------- configuration (mirrors xml_cnn __init__ params) -------------
VOCAB = 64
EMB_DIM = 16            # emb_dim (embedding_weights.shape[1])
SEQ_LEN = 16            # params['sequence_length']
FILTER_SIZES = (2, 4)   # params['filter_sizes']
STRIDES = (1, 1)        # params['stride']
FILTER_CHANNELS = 4     # params['filter_channels']
D_MAX_POOL_P = (4, 4)   # params['d_max_pool_p']
HIDDEN_DIMS = 32        # params['hidden_dims']
NUM_CLASS = 8           # params['num_of_class']
BATCH = 2

NCOL = 128              # lane-dense working width (conv cols / hidden / classes)


def conv_out_h(L, fsz, ssz):
    return (L - fsz) // ssz + 1


def _round_up(x, m):
    return ((x + m - 1) // m) * m


# --------------------------------- kernel -------------------------------------
def make_xml_cnn_kernel(Bp, Hpad, C, h_limits, ncol, w2_off, b2_off):
    """Bp: padded batch (sublane-dense), Hpad: padded conv-H, C: channels/filter,
    h_limits[i]: valid conv output length of filter i, ncol: lane width (128),
    w2_off/b2_off: row offsets of the l2 weight / bias inside the dense pack."""
    nf = len(h_limits)

    def kernel(x_ref, convw_ref, dense_ref, o_ref):
        # ---- conv stage: ONE fused affine matmul for all batches and all
        #      filters (bias comes in via the ones column of x).
        acc = jnp.dot(x_ref[...], convw_ref[...],
                      preferred_element_type=jnp.float32)       # (Bp*Hpad, ncol)

        # ---- channel-major flatten + MaxPool1d + ReLU, specialized to n == C:
        #      pool window j is exactly output channel j, so pooling is a single
        #      max over the H axis.  Rows h >= h_limits[i] are im2col padding
        #      rows and are masked to -inf before the max.  Built once, no loops
        #      over batch or filters.
        h_idx = jax.lax.broadcasted_iota(jnp.int32, (Bp, Hpad, ncol), 1)
        c_idx = jax.lax.broadcasted_iota(jnp.int32, (Bp, Hpad, ncol), 2)
        lim = jnp.full((Bp, Hpad, ncol), Hpad, jnp.int32)
        for i in range(nf):                                     # nf=2 static unroll
            lim = jnp.where((c_idx >= i * C) & (c_idx < (i + 1) * C),
                            h_limits[i], lim)
        acc3 = jnp.where(h_idx < lim,
                         acc.reshape(Bp, Hpad, ncol), -jnp.inf)
        feat = jnp.max(acc3, axis=1)                            # (Bp, ncol)
        # ReLU applied after pooling (max and ReLU commute; matches
        # relu(maxpool(conv)) of the PyTorch module — keep this order).
        feat = jnp.maximum(feat, 0.0)

        # ---- dense head: relu(l1) -> l2 (dropout = identity at inference) ----
        h1 = (jnp.dot(feat, dense_ref[0:ncol, :],
                      preferred_element_type=jnp.float32)
              + dense_ref[ncol:ncol + 1, :])
        h1 = jnp.maximum(h1, 0.0)
        y = (jnp.dot(h1, dense_ref[w2_off:w2_off + ncol, :],
                     preferred_element_type=jnp.float32)
             + dense_ref[b2_off:b2_off + 1, :])
        o_ref[...] = y                              # full (8, 128) unmasked slab

    return kernel


# --------------------------------- wrapper ------------------------------------
def xml_cnn_forward(emb, conv_ws, conv_bs, l1w, l1b, l2w, l2b):
    B, L, E = emb.shape
    C = conv_ws[0].shape[-1]
    nf = len(FILTER_SIZES)
    fin = sum(D_MAX_POOL_P)
    hidden = l1w.shape[1]
    nclass = l2w.shape[1]

    # ---- build-time checks for the specialized fast paths --------------------
    Hs = [conv_out_h(L, f, s) for f, s in zip(FILTER_SIZES, STRIDES)]
    for H, n in zip(Hs, D_MAX_POOL_P):
        assert (C * H) % n == 0                  # PyTorch module asserts this too
        assert n == C, "fast-path pooling requires d_max_pool_p == filter_channels"
    assert all(s == 1 for s in STRIDES), "fused shared im2col assumes stride 1"
    assert max(fin, hidden, nclass, nf * C) <= NCOL

    max_fsz = max(FILTER_SIZES)
    Hpad = _round_up(max(Hs), 8)                 # 16  -> Bp*Hpad = 128 rows
    Bp = _round_up(max(B, 8), 8)                 # 8   -> sublane-dense output
    KW = max_fsz * E                             # 64  shared im2col width
    KP = _round_up(KW + 1, 8)                    # 72  (+ ones/bias column, padded)
    Lpad = Hpad - 1 + max_fsz                    # padded sequence for im2col

    # ---- host-side packing (layout plumbing only, no compute hoisting) -------
    # Shared im2col for the widest filter window; narrower filters consume a
    # zero-padded prefix of the same window.  Trailing ones column folds bias.
    emb_pad = jnp.zeros((Bp, Lpad, E), jnp.float32).at[:B, :L, :].set(emb)
    x3 = jnp.concatenate([emb_pad[:, dh:dh + Hpad, :] for dh in range(max_fsz)],
                         axis=2)                                # (Bp, Hpad, KW)
    x_pack = jnp.zeros((Bp * Hpad, KP), jnp.float32)
    x_pack = x_pack.at[:, :KW].set(x3.reshape(Bp * Hpad, KW))
    x_pack = x_pack.at[:, KW].set(1.0)                          # bias column

    # Column-blocked conv weights: filter i -> output columns [i*C, (i+1)*C).
    convw = jnp.zeros((KP, NCOL), jnp.float32)
    for i, (w, b) in enumerate(zip(conv_ws, conv_bs)):
        fsz = w.shape[0]
        convw = convw.at[:fsz * E, i * C:(i + 1) * C].set(w.reshape(-1, C))
        convw = convw.at[KW, i * C:(i + 1) * C].set(b[0])

    # Dense pack, zero-padded to 128 lanes; all slice starts are 8-aligned.
    w2_off = NCOL + 8
    b2_off = w2_off + NCOL
    dr = b2_off + 8
    dense = jnp.zeros((dr, NCOL), jnp.float32)
    dense = dense.at[:fin, :hidden].set(l1w)
    dense = dense.at[NCOL, :hidden].set(l1b[0])
    dense = dense.at[w2_off:w2_off + hidden, :nclass].set(l2w)
    dense = dense.at[b2_off, :nclass].set(l2b[0])

    kernel = make_xml_cnn_kernel(Bp, Hpad, C, tuple(Hs), NCOL, w2_off, b2_off)

    y_pad = pl.pallas_call(
        kernel,
        out_shape=jax.ShapeDtypeStruct((Bp, NCOL), jnp.float32),
        grid_spec=pltpu.PrefetchScalarGridSpec(
            num_scalar_prefetch=0,
            grid=(1,),
            in_specs=[
                pl.BlockSpec(x_pack.shape, lambda i: (0, 0)),
                pl.BlockSpec(convw.shape, lambda i: (0, 0)),
                pl.BlockSpec(dense.shape, lambda i: (0, 0)),
            ],
            out_specs=pl.BlockSpec((Bp, NCOL), lambda i: (0, 0)),
        ),
        compiler_params=pltpu.CompilerParams(
            dimension_semantics=("arbitrary",)),
    )(x_pack, convw, dense)
    return y_pad[:B, :nclass]


# --------------------------- deterministic parameters --------------------------
def init_params(key):
    keys = list(jax.random.split(key, 16))
    ki = iter(keys)
    emb_table = jax.random.normal(next(ki), (VOCAB, EMB_DIM), jnp.float32) * 0.1

    conv_ws, conv_bs = [], []
    for fsz in FILTER_SIZES:
        fan_in = 1 * fsz * EMB_DIM
        w = jax.random.normal(next(ki), (FILTER_CHANNELS, fsz, EMB_DIM),
                              jnp.float32) * jnp.sqrt(2.0 / fan_in)   # kaiming
        bvec = (jax.random.uniform(next(ki), (FILTER_CHANNELS,),
                                   minval=-1.0, maxval=1.0)
                / jnp.sqrt(float(fan_in)))
        conv_ws.append(jnp.transpose(w, (1, 2, 0)).astype(jnp.float32))  # (fsz,E,C)
        conv_bs.append(bvec.reshape(1, FILTER_CHANNELS).astype(jnp.float32))

    fin = sum(D_MAX_POOL_P)
    l1w = jax.random.normal(next(ki), (HIDDEN_DIMS, fin)) * jnp.sqrt(2.0 / fin)
    l1b = (jax.random.uniform(next(ki), (HIDDEN_DIMS,), minval=-1.0, maxval=1.0)
           / jnp.sqrt(float(fin)))
    l2w = jax.random.normal(next(ki), (NUM_CLASS, HIDDEN_DIMS)) \
        * jnp.sqrt(2.0 / HIDDEN_DIMS)
    l2b = (jax.random.uniform(next(ki), (NUM_CLASS,), minval=-1.0, maxval=1.0)
           / jnp.sqrt(float(HIDDEN_DIMS)))
    return (emb_table, conv_ws, conv_bs,
            l1w.T.astype(jnp.float32), l1b.reshape(1, -1).astype(jnp.float32),
            l2w.T.astype(jnp.float32), l2b.reshape(1, -1).astype(jnp.float32))


# ------------------------------ pure-JAX reference -----------------------------
def reference(emb, conv_ws, conv_bs, l1w, l1b, l2w, l2b):
    B = emb.shape[0]
    feats = []
    for i, (fsz, ssz, n) in enumerate(zip(FILTER_SIZES, STRIDES, D_MAX_POOL_P)):
        H = conv_out_h(SEQ_LEN, fsz, ssz)
        acc = jnp.zeros((B, H, FILTER_CHANNELS), jnp.float32)
        for dh in range(fsz):
            x_sl = emb[:, dh:dh + (H - 1) * ssz + 1:ssz, :]
            acc = acc + jnp.einsum('ble,ec->blc', x_sl, conv_ws[i][dh])
        acc = acc + conv_bs[i]
        flat = jnp.transpose(acc, (0, 2, 1)).reshape(B, FILTER_CHANNELS * H)
        K = (FILTER_CHANNELS * H) // n
        pooled = jnp.max(flat.reshape(B, n, K), axis=-1)
        feats.append(jnp.maximum(pooled, 0.0))
    h = jnp.concatenate(feats, axis=1)
    h1 = jnp.maximum(h @ l1w + l1b, 0.0)
    return h1 @ l2w + l2b


# ------------------------------------ main --------------------------------------
if __name__ == "__main__":
    key = jax.random.PRNGKey(0)
    k_tok, k_par = jax.random.split(key)

    (emb_table, conv_ws, conv_bs, l1w, l1b, l2w, l2b) = init_params(k_par)

    # input token ids (the module's `x`)
    tokens = jax.random.randint(k_tok, (BATCH, SEQ_LEN), 0, VOCAB, dtype=jnp.int32)

    # embedding lookup (nn.Embedding) done as plain-JAX glue (gather)
    emb = emb_table[tokens].astype(jnp.float32)     # (B, L, E)

    y = xml_cnn_forward(emb, conv_ws, conv_bs, l1w, l1b, l2w, l2b)
    y = jax.block_until_ready(y)

    y_ref = reference(emb, conv_ws, conv_bs, l1w, l1b, l2w, l2b)
    assert y.shape == (BATCH, NUM_CLASS)
    assert jnp.allclose(y, y_ref, rtol=1e-4, atol=1e-4), (y, y_ref)

    print("KERNEL_OK")
</pallas_src>

<mosaic_0001>
module attributes {stable_mosaic.version = 11 : i64} {
  func.func @kernel(%arg0: i32, %arg1: memref<128x72xf32, #tpu.memory_space<vmem>>, %arg2: memref<72x128xf32, #tpu.memory_space<vmem>>, %arg3: memref<272x128xf32, #tpu.memory_space<vmem>>, %arg4: memref<8x128xf32, #tpu.memory_space<vmem>>) attributes {dimension_semantics = [#tpu.dimension_semantics<arbitrary>], iteration_bounds = array<i64: 1>, scalar_prefetch = 0 : i64, scratch_operands = 0 : i64, tpu.core_type = #tpu.core_type<tc>, window_params = [{pipeline_mode = #tpu.pipeline_mode<synchronous>, transform_indices = @transform_0, window_bounds = array<i64: 128, 72>}, {pipeline_mode = #tpu.pipeline_mode<synchronous>, transform_indices = @transform_1, window_bounds = array<i64: 72, 128>}, {pipeline_mode = #tpu.pipeline_mode<synchronous>, transform_indices = @transform_2, window_bounds = array<i64: 272, 128>}, {pipeline_mode = #tpu.pipeline_mode<synchronous>, transform_indices = @transform_3, window_bounds = array<i64: 8, 128>}]} {
    %c0 = arith.constant 0 : index
    %c0_0 = arith.constant 0 : index
    %0 = vector.load %arg1[%c0, %c0_0] : memref<128x72xf32, #tpu.memory_space<vmem>>, vector<128x72xf32>
    %c0_1 = arith.constant 0 : index
    %c0_2 = arith.constant 0 : index
    %1 = vector.load %arg2[%c0_1, %c0_2] : memref<72x128xf32, #tpu.memory_space<vmem>>, vector<72x128xf32>
    %cst = arith.constant dense<0.000000e+00> : vector<128x128xf32>
    %2 = tpu.matmul %0, %1, %cst {dimension_numbers = #tpu.dot_dimension_numbers<[1], [0], [0], [1], [0, 0, 1, 1], [], []>} : vector<128x72xf32>, vector<72x128xf32>, vector<128x128xf32> -> vector<128x128xf32>
    %3 = tpu.iota {dimensions = array<i32: 1>} : vector<8x16x128xi32>
    %4 = tpu.iota {dimensions = array<i32: 2>} : vector<8x16x128xi32>
    %c16_i32 = arith.constant 16 : i32
    %5 = vector.broadcast %c16_i32 : i32 to vector<8x16x128xi32>
    %c0_i32 = arith.constant 0 : i32
    %6 = vector.broadcast %c0_i32 : i32 to vector<8x16x128xi32>
    %7 = arith.cmpi sge, %4, %6 : vector<8x16x128xi32>
    %c4_i32 = arith.constant 4 : i32
    %8 = vector.broadcast %c4_i32 : i32 to vector<8x16x128xi32>
    %9 = arith.cmpi slt, %4, %8 : vector<8x16x128xi32>
    %10 = arith.andi %7, %9 : vector<8x16x128xi1>
    %c15_i32 = arith.constant 15 : i32
    %11 = vector.broadcast %c15_i32 : i32 to vector<8x16x128xi32>
    %12 = arith.select %10, %11, %5 : vector<8x16x128xi1>, vector<8x16x128xi32>
    %c4_i32_3 = arith.constant 4 : i32
    %13 = vector.broadcast %c4_i32_3 : i32 to vector<8x16x128xi32>
    %14 = arith.cmpi sge, %4, %13 : vector<8x16x128xi32>
    %c8_i32 = arith.constant 8 : i32
    %15 = vector.broadcast %c8_i32 : i32 to vector<8x16x128xi32>
    %16 = arith.cmpi slt, %4, %15 : vector<8x16x128xi32>
    %17 = arith.andi %14, %16 : vector<8x16x128xi1>
    %c13_i32 = arith.constant 13 : i32
    %18 = vector.broadcast %c13_i32 : i32 to vector<8x16x128xi32>
    %19 = arith.select %17, %18, %12 : vector<8x16x128xi1>, vector<8x16x128xi32>
    %20 = arith.cmpi slt, %3, %19 : vector<8x16x128xi32>
    %21 = vector.shape_cast %2 : vector<128x128xf32> to vector<8x16x128xf32>
    %cst_4 = arith.constant 0xFF800000 : f32
    %22 = vector.broadcast %cst_4 : f32 to vector<8x16x128xf32>
    %23 = arith.select %20, %21, %22 : vector<8x16x128xi1>, vector<8x16x128xf32>
    %cst_5 = arith.constant dense<0xFF800000> : vector<8x128xf32>
    %24 = vector.multi_reduction <maximumf>, %23, %cst_5 [1] : vector<8x16x128xf32> to vector<8x128xf32>
    %cst_6 = arith.constant 0.000000e+00 : f32
    %25 = vector.broadcast %cst_6 : f32 to vector<8x128xf32>
    %26 = arith.maximumf %24, %25 : vector<8x128xf32>
    %c0_7 = arith.constant 0 : index
    %c0_8 = arith.constant 0 : index
    %27 = vector.load %arg3[%c0_7, %c0_8] : memref<272x128xf32, #tpu.memory_space<vmem>>, vector<128x128xf32>
    %cst_9 = arith.constant dense<0.000000e+00> : vector<8x128xf32>
    %28 = tpu.matmul %26, %27, %cst_9 {dimension_numbers = #tpu.dot_dimension_numbers<[1], [0], [0], [1], [0, 0, 1, 1], [], []>} : vector<8x128xf32>, vector<128x128xf32>, vector<8x128xf32> -> vector<8x128xf32>
    %c128 = arith.constant 128 : index
    %c0_10 = arith.constant 0 : index
    %29 = vector.load %arg3[%c128, %c0_10] : memref<272x128xf32, #tpu.memory_space<vmem>>, vector<1x128xf32>
    %30 = vector.broadcast %29 : vector<1x128xf32> to vector<8x128xf32>
    %31 = arith.addf %28, %30 : vector<8x128xf32>
    %cst_11 = arith.constant 0.000000e+00 : f32
    %32 = vector.broadcast %cst_11 : f32 to vector<8x128xf32>
    %33 = arith.maximumf %31, %32 : vector<8x128xf32>
    %c136 = arith.constant 136 : index
    %c0_12 = arith.constant 0 : index
    %34 = vector.load %arg3[%c136, %c0_12] : memref<272x128xf32, #tpu.memory_space<vmem>>, vector<128x128xf32>
    %cst_13 = arith.constant dense<0.000000e+00> : vector<8x128xf32>
    %35 = tpu.matmul %33, %34, %cst_13 {dimension_numbers = #tpu.dot_dimension_numbers<[1], [0], [0], [1], [0, 0, 1, 1], [], []>} : vector<8x128xf32>, vector<128x128xf32>, vector<8x128xf32> -> vector<8x128xf32>
    %c264 = arith.constant 264 : index
    %c0_14 = arith.constant 0 : index
    %36 = vector.load %arg3[%c264, %c0_14] : memref<272x128xf32, #tpu.memory_space<vmem>>, vector<1x128xf32>
    %37 = vector.broadcast %36 : vector<1x128xf32> to vector<8x128xf32>
    %38 = arith.addf %35, %37 : vector<8x128xf32>
    %c0_15 = arith.constant 0 : index
    %c0_16 = arith.constant 0 : index
    %39 = vector.load %arg4[%c0_15, %c0_16] : memref<8x128xf32, #tpu.memory_space<vmem>>, vector<8x128xf32>
    tpu.vector_store %arg4[%c0_15, %c0_16], %38 {strides = array<i32>} : memref<8x128xf32, #tpu.memory_space<vmem>>, vector<8x128xf32>,
    return
  }
  func.func @transform_0(%arg0: i32) -> (i32, i32) {
    %c0_i32 = arith.constant 0 : i32
    %c0_i32_0 = arith.constant 0 : i32
    %c0_i32_1 = arith.constant 0 : i32
    return %c0_i32, %c0_i32_0 : i32, i32
  }
  func.func @transform_1(%arg0: i32) -> (i32, i32) {
    %c0_i32 = arith.constant 0 : i32
    %c0_i32_0 = arith.constant 0 : i32
    %c0_i32_1 = arith.constant 0 : i32
    return %c0_i32, %c0_i32_0 : i32, i32
  }
  func.func @transform_2(%arg0: i32) -> (i32, i32) {
    %c0_i32 = arith.constant 0 : i32
    %c0_i32_0 = arith.constant 0 : i32
    %c0_i32_1 = arith.constant 0 : i32
    return %c0_i32, %c0_i32_0 : i32, i32
  }
  func.func @transform_3(%arg0: i32) -> (i32, i32) {
    %c0_i32 = arith.constant 0 : i32
    %c0_i32_0 = arith.constant 0 : i32
    %c0_i32_1 = arith.constant 0 : i32
    return %c0_i32, %c0_i32_0 : i32, i32
  }
}

</mosaic_0001>

<bundles_post_ra>
// kernel: tpu_custom_call.1
= control target key start
LH: loop header
LB: loop body
LE: loop exit
PB: predicated region body
PF: predicated region fallthrough
CT: control target
= control target key end

     0   :  { %8 = vsyncpa [#allocation3], 0  ;;  %s1053_s0 = inlined_call_operand.vmem [shape: f32[128,72], index: 0, kind: input, shape index: {}]   ;;  %s1054_s1 = inlined_call_operand.vmem [shape: f32[72,128], index: 1, kind: input, shape index: {}]   ;;  %s1055_s2 = inlined_call_operand.hbm [shape: f32[272,128], index: 2, kind: input, shape index: {}]   ;;  %s1056_s3 = inlined_call_operand.hbm [shape: f32[8,128], index: 3, kind: output, shape index: {}]  }
   0x1   :  { %9 = vsyncpa [#allocation4], 0  ;;  %s874_s12 = smov [#allocation2]   ;;  %s826_s16 = scalar_lea.hbm %s1055_s2, 4352 }
   0x2   :  { %s19_s13 = sshll.u32 %s874_s12, 4  ;;  %p827_p0 = scmp.ne.s32.totalorder %s1055_s2, %s826_s16  ;;  %s20_s13 = int_to_ptr.vmem [resolvable:$true] %s19_s13 }
   0x3   :  { %p830_p1 = scmp.lt.u32.totalorder %s826_s16, %s1055_s2 }
   0x5   :  { %p832_p2 = pnand %p830_p1, %p827_p0 }
   0x7   :  { %835 = shalt.err (!%p832_p2)
}
   0x8   :  { %s836_s21 = scalar_lea.vmem %s20_s13, 4352  ;;  %p841_p4 = scmp.lt.s32.totalorder %s20_s13, %s20_s13 }
   0x9   :  { %p837_p3 = scmp.ne.s32.totalorder %s20_s13, %s836_s21  ;;  %p842_p5 = scmp.lt.s32.totalorder %s836_s21, %s836_s21 }
   0xb   :  { %p843_p6 = por %p842_p5, %p841_p4 }
   0xd   :  { %p844_p7 = pnand %p843_p6, %p837_p3 }
   0xf   :  { %847 = shalt.err (!%p844_p7)
}
  0x10   :  { %s875_s22 = smov 128   ;;  %s876_s23 = smov 8  }
  0x11   :  { %25 = dma.hbm_to_vmem [thread:$0]  %s1055_s2, 4352, %s20_s13, [#allocation3], %s875_s22, %s875_s22, %s876_s23  }
  0x12   :  { %870 = dma.done.wait [#allocation3], 4352  }
  0x13   :  { %871 = vsyncadd [#allocation3], 4294962944  ;;  %v45_v0 = vld [vmem:[%s1054_s1] sm:$0xff]  ;;  %v46_v1 = vld [vmem:[%s1054_s1 + $0x8] sm:$0xff]  ;;  %vm54_vm0 = vcmask 588800   ;;  %v877_v32 = vmov 0.0|0.0  }
  0x14   :  { %v47_v2 = vld [vmem:[%s1054_s1 + $0x10] sm:$0xff]  ;;  %v754_v3 = vpack.c.bf16 %v46_v1, %v45_v0  ;;  %v48_v4 = vld [vmem:[%s1054_s1 + $0x18] sm:$0xff]  ;;  %v49_v6 = vld [vmem:[%s1054_s1 + $0x20] sm:$0xff]  ;;  %770 = vmatprep.subr.bf16.mxu1 %v877_v32  ;;  %vm878_vm1 = vmmov 0   ;;  %v879_v54 = vmov 0.0   ;;  %vm372_vm7 = vcmask 1041409  }
  0x15   :  { %v758_v5 = vpack.c.bf16 %v48_v4, %v47_v2  ;;  %v50_v7 = vld [vmem:[%s1054_s1 + $0x28] sm:$0xff]  ;;  %v29_v8 = vld [vmem:[%s1053_s0] sm:$0xff]  ;;  %v51_v10 = vld [vmem:[%s1054_s1 + $0x30] sm:$0xff]  ;;  %716 = vmatprep.mubr.msk.f32.mxu1 %vm878_vm1, %v879_v54  ;;  %vm374_vm8 = vcmask 1042434   ;;  %vm376_vm9 = vcmask 1043459   ;;  %vm378_vm10 = vcmask 1044484  }
  0x16   :  { %755 = vmatprep.subr.bf16.mxu0 %v754_v3  ;;  %660 = vmatprep.mubr.msk.f32.mxu0 %vm54_vm0, %v29_v8  ;;  %v762_v9 = vpack.c.bf16 %v50_v7, %v49_v6  ;;  %v52_v11 = vld [vmem:[%s1054_s1 + $0x38] sm:$0xff]  ;;  %v53_v13 = vld [vmem:[%s1054_s1 + $0x40] sm:$0xff]  ;;  %v30_v14 = vld [vmem:[%s1053_s0 + $0x8] sm:$0xff]  ;;  %vm380_vm11 = vcmask 1045509   ;;  %vm382_vm12 = vcmask 1046534   ;;  %vm384_vm13 = vcmask 1047559  }
  0x17   :  { %757 = vmatpush3.bf16.msra.mxu0 %v754_v3  ;;  %v766_v12 = vpack.c.bf16 %v52_v11, %v51_v10  ;;  %v31_v15 = vld [vmem:[%s1053_s0 + $0x10] sm:$0xff]  ;;  %v32_v16 = vld [vmem:[%s1053_s0 + $0x18] sm:$0xff]  ;;  %v33_v17 = vld [vmem:[%s1053_s0 + $0x20] sm:$0xff] }
  0x18   :  { %759 = vmatprep.subr.bf16.mxu0 %v758_v5  ;;  %v34_v18 = vld [vmem:[%s1053_s0 + $0x28] sm:$0xff]  ;;  %v35_v19 = vld [vmem:[%s1053_s0 + $0x30] sm:$0xff]  ;;  %v36_v20 = vld [vmem:[%s1053_s0 + $0x38] sm:$0xff] }
  0x19   :  { %v37_v21 = vld [vmem:[%s1053_s0 + $0x40] sm:$0xff]  ;;  %v38_v22 = vld [vmem:[%s1053_s0 + $0x48] sm:$0xff]  ;;  %v39_v23 = vld [vmem:[%s1053_s0 + $0x50] sm:$0xff] }
  0x1a   :  { %v40_v24 = vld [vmem:[%s1053_s0 + $0x58] sm:$0xff]  ;;  %v41_v25 = vld [vmem:[%s1053_s0 + $0x60] sm:$0xff]  ;;  %v42_v26 = vld [vmem:[%s1053_s0 + $0x68] sm:$0xff] }
  0x1b   :  { %761 = vmatpush3.bf16.msra.mxu0 %v758_v5  ;;  %v43_v27 = vld [vmem:[%s1053_s0 + $0x70] sm:$0xff]  ;;  %v44_v28 = vld [vmem:[%s1053_s0 + $0x78] sm:$0xff]  ;;  %v343_v29 = vld [vmem:[#allocation2] sm:$0xff]  ;;  %s881_s0 = smov [#allocation5]  }
  0x1c   :  { %763 = vmatprep.subr.bf16.mxu0 %v762_v9  ;;  %v344_v30 = vld [vmem:[#allocation2 + $0x8] sm:$0xff]  ;;  %v345_v33 = vld [vmem:[#allocation2 + $0x10] sm:$0xff]  ;;  %v346_v34 = vld [vmem:[#allocation2 + $0x18] sm:$0xff]  ;;  %s556_s19 = sshll.u32 %s881_s0, 4  ;;  %s557_s19 = int_to_ptr.vmem [resolvable:$true] %s556_s19 }
  0x1d   :  { %v771_v31 = vpack.c.bf16 %v344_v30, %v343_v29  ;;  %v774_v35 = vpack.c.bf16 %v346_v34, %v345_v33  ;;  %v347_v36 = vld [vmem:[#allocation2 + $0x20] sm:$0xff]  ;;  %v348_v37 = vld [vmem:[#allocation2 + $0x28] sm:$0xff]  ;;  %v349_v39 = vld [vmem:[#allocation2 + $0x30] sm:$0xff]  ;;  %s848_s20 = scalar_lea.vmem %s557_s19, 128  ;;  %p853_p9 = scmp.lt.s32.totalorder %s557_s19, %s557_s19 }
  0x1e   :  { %v777_v38 = vpack.c.bf16 %v348_v37, %v347_v36  ;;  %v350_v40 = vld [vmem:[#allocation2 + $0x38] sm:$0xff]  ;;  %v351_v42 = vld [vmem:[#allocation2 + $0x40] sm:$0xff]  ;;  %v352_v43 = vld [vmem:[#allocation2 + $0x48] sm:$0xff]  ;;  %p849_p8 = scmp.ne.s32.totalorder %s557_s19, %s848_s20  ;;  %p854_p10 = scmp.lt.s32.totalorder %s848_s20, %s848_s20 }
  0x1f   :  { %765 = vmatpush3.bf16.msra.mxu0 %v762_v9  ;;  %772 = vmatpush3.bf16.msra.mxu1 %v771_v31  ;;  %v780_v41 = vpack.c.bf16 %v350_v40, %v349_v39  ;;  %v783_v44 = vpack.c.bf16 %v352_v43, %v351_v42  ;;  %v353_v45 = vld [vmem:[#allocation2 + $0x50] sm:$0xff]  ;;  %v354_v46 = vld [vmem:[#allocation2 + $0x58] sm:$0xff]  ;;  %v355_v48 = vld [vmem:[#allocation2 + $0x60] sm:$0xff] }
  0x20   :  { %767 = vmatprep.subr.bf16.mxu0 %v766_v12  ;;  %773 = vmatprep.subr.bf16.mxu1 %v877_v32  ;;  %v786_v47 = vpack.c.bf16 %v354_v46, %v353_v45  ;;  %v356_v49 = vld [vmem:[#allocation2 + $0x68] sm:$0xff]  ;;  %v357_v51 = vld [vmem:[#allocation2 + $0x70] sm:$0xff]  ;;  %v358_v52 = vld [vmem:[#allocation2 + $0x78] sm:$0xff]  ;;  %p855_p11 = por %p854_p10, %p853_p9 }
  0x21   :  { %v789_v50 = vpack.c.bf16 %v356_v49, %v355_v48  ;;  %v792_v53 = vpack.c.bf16 %v358_v52, %v357_v51  ;;  %v458_v55 = vld [vmem:[#allocation2 + $0x88] sm:$0xff]  ;;  %v459_v56 = vld [vmem:[#allocation2 + $0x90] sm:$0xff]  ;;  %v460_v57 = vld [vmem:[#allocation2 + $0x98] sm:$0xff] }
  0x22   :  { %v795_v58 = vpack.c.bf16 %v459_v56, %v458_v55  ;;  %v461_v59 = vld [vmem:[#allocation2 + $0xa0] sm:$0xff]  ;;  %v462_v61 = vld [vmem:[#allocation2 + $0xa8] sm:$0xff]  ;;  %v463_v62 = vld [vmem:[#allocation2 + $0xb0] sm:$0xff]  ;;  %p856_p12 = pnand %p855_p11, %p849_p8 }
  0x23   :  { %769 = vmatpush3.bf16.msra.mxu0 %v766_v12  ;;  %775 = vmatpush3.bf16.msra.mxu1 %v774_v35  ;;  %v798_v60 = vpack.c.bf16 %v461_v59, %v460_v57  ;;  %v801_v63 = vpack.c.bf16 %v463_v62, %v462_v61  ;;  %v464_v0 = vld [vmem:[#allocation2 + $0xb8] sm:$0xff]  ;;  %v465_v1 = vld [vmem:[#allocation2 + $0xc0] sm:$0xff]  ;;  %v466_v3 = vld [vmem:[#allocation2 + $0xc8] sm:$0xff]  ;;  %v248_v12 = vlaneseq }
  0x24   :  { %658 = vmatprep.subr.mxu0 %v53_v13  ;;  %776 = vmatprep.subr.bf16.mxu1 %v877_v32  ;;  %v804_v2 = vpack.c.bf16 %v465_v1, %v464_v0  ;;  %v467_v4 = vld [vmem:[#allocation2 + $0xd0] sm:$0xff]  ;;  %v468_v6 = vld [vmem:[#allocation2 + $0xd8] sm:$0xff]  ;;  %v469_v7 = vld [vmem:[#allocation2 + $0xe0] sm:$0xff] }
  0x25   :  { %v807_v5 = vpack.c.bf16 %v467_v4, %v466_v3  ;;  %v810_v8 = vpack.c.bf16 %v469_v7, %v468_v6  ;;  %v470_v9 = vld [vmem:[#allocation2 + $0xe8] sm:$0xff]  ;;  %v471_v10 = vld [vmem:[#allocation2 + $0xf0] sm:$0xff] }
  0x26   :  { %v813_v11 = vpack.c.bf16 %v471_v10, %v470_v9 }
  0x27   :  { %659 = vmatpush3.msra.mxu0 %v53_v13  ;;  %778 = vmatpush3.bf16.msra.mxu1 %v777_v38  ;;  %v252_v13 = vand.u32 127, %v248_v12 }
  0x28   :  { %661 = vmatmul.mubr.msk.f32.vlgmr.msra.gmra.mrb[0].mxu0 %vm54_vm0, %v30_v14  ;;  %794 = vmatprep.subr.bf16.mxu0 %v877_v32  ;;  %v249_v14 = vshrl.u32 %v248_v12, 7 }
  0x29   :  { %663 = vmatprep.mubr.msk.f32.mxu0 %vm54_vm0, %v31_v15  ;;  %779 = vmatprep.subr.bf16.mxu1 %v877_v32  ;;  %vm254_vm2 = vcmp.lt.s32.totalorder %v252_v13, 4  ;;  %vm257_vm3 = vcmp.ge.s32.totalorder %v252_v13, 4  ;;  %vm258_vm4 = vcmp.lt.s32.totalorder %v252_v13, 8  ;;  %v880_v15 = vmov 16  }
  0x2a   :  { %796 = vmatpush3.bf16.msra.mxu0 %v795_v58  ;;  %vm259_vm5 = vmand %vm257_vm3, %vm258_vm4 }
  0x2b   :  { %781 = vmatpush3.bf16.msra.mxu1 %v780_v41  ;;  %797 = vmatprep.subr.bf16.mxu0 %v877_v32 }
  0x2c   :  { %664 = vmatmul.mubr.msk.f32.gmra.mrb[2].mxu0 %vm54_vm0, %v32_v16  ;;  %782 = vmatprep.subr.bf16.mxu1 %v877_v32  ;;  %v256_v16 = vsel %vm254_vm2, 15, %v880_v15 }
  0x2d   :  { %666 = vmatprep.mubr.msk.f32.mxu0 %vm54_vm0, %v33_v17  ;;  %v250_v17 = vadd.s32 8, %v249_v14 }
  0x2e   :  { %799 = vmatpush3.bf16.msra.mxu0 %v798_v60 }
  0x2f   :  { %784 = vmatpush3.bf16.msra.mxu1 %v783_v44  ;;  %800 = vmatprep.subr.bf16.mxu0 %v877_v32 }
  0x30   :  { %667 = vmatmul.mubr.msk.f32.gmra.mrb[4].mxu0 %vm54_vm0, %v34_v18  ;;  %785 = vmatprep.subr.bf16.mxu1 %v877_v32  ;;  %v260_v18 = vsel %vm259_vm5, 13, %v256_v16 }
  0x31   :  { %669 = vmatprep.mubr.msk.f32.mxu0 %vm54_vm0, %v35_v19  ;;  %vm1021_vm6 = vcmp.lt.s32.totalorder %v250_v17, %v260_v18 }
  0x32   :  { %802 = vmatpush3.bf16.msra.mxu0 %v801_v63 }
  0x33   :  { %787 = vmatpush3.bf16.msra.mxu1 %v786_v47  ;;  %803 = vmatprep.subr.bf16.mxu0 %v877_v32 }
  0x34   :  { %670 = vmatmul.mubr.msk.f32.gmra.mrb[6].mxu0 %vm54_vm0, %v36_v20  ;;  %788 = vmatprep.subr.bf16.mxu1 %v877_v32 }
  0x35   :  { %672 = vmatprep.mubr.msk.f32.mxu0 %vm54_vm0, %v37_v21 }
  0x36   :  { %805 = vmatpush3.bf16.msra.mxu0 %v804_v2 }
  0x37   :  { %790 = vmatpush3.bf16.msra.mxu1 %v789_v50  ;;  %806 = vmatprep.subr.bf16.mxu0 %v877_v32 }
  0x38   :  { %673 = vmatmul.mubr.msk.f32.gmra.mrb[8].mxu0 %vm54_vm0, %v38_v22  ;;  %791 = vmatprep.subr.bf16.mxu1 %v877_v32 }
  0x39   :  { %675 = vmatprep.mubr.msk.f32.mxu0 %vm54_vm0, %v39_v23 }
  0x3a   :  { %808 = vmatpush3.bf16.msra.mxu0 %v807_v5 }
  0x3b   :  { %793 = vmatpush3.bf16.msra.mxu1 %v792_v53  ;;  %809 = vmatprep.subr.bf16.mxu0 %v877_v32 }
  0x3c   :  { %676 = vmatmul.mubr.msk.f32.gmra.mrb[10].mxu0 %vm54_vm0, %v40_v24 }
  0x3d   :  { %678 = vmatprep.mubr.msk.f32.mxu0 %vm54_vm0, %v41_v25 }
  0x3e   :  { %811 = vmatpush3.bf16.msra.mxu0 %v810_v8 }
  0x3f   :  { %812 = vmatprep.subr.bf16.mxu0 %v877_v32 }
  0x40   :  { %679 = vmatmul.mubr.msk.f32.gmra.mrb[12].mxu0 %vm54_vm0, %v42_v26 }
  0x41   :  { %681 = vmatprep.mubr.msk.f32.mxu0 %vm54_vm0, %v43_v27 }
  0x42   :  { %814 = vmatpush3.bf16.msra.mxu0 %v813_v11 }
  0x43   :  { %815 = vmatprep.subr.bf16.mxu0 %v877_v32 }
  0x44   :  { %682 = vmatmul.mubr.msk.f32.gmra.mrb[14].mxu0 %vm54_vm0, %v44_v28 }
  0x45   :  { %751 = vmatprep.mubr.msk.f32.mxu0 %vm878_vm1, %v879_v54 }
  0xfb   :  { %v662_v20 = vpop.f32.mrb[0].mxu0 }
  0xfc   :  { %v264_v21 = vsel %vm1021_vm6, %v662_v20, -inf  ;;  %v169_v22 = vpop.f32.mrb[1].mxu0 }
  0xfd   :  { %v279_v23 = vmax.f32 %v169_v22, %v264_v21 }
  0xff   :  { %v280_v24 = vrot.slane %v279_v23, 4  ;;  %v665_v25 = vpop.f32.mrb[2].mxu0 }
 0x100   :  { %v266_v26 = vsel %vm1021_vm6, %v665_v25, -inf  ;;  %v179_v27 = vpop.f32.mrb[3].mxu0 }
 0x101   :  { %v281_v28 = vmax.f32 %v279_v23, %v280_v24  ;;  %v286_v29 = vmax.f32 %v179_v27, %v266_v26 }
 0x103   :  { %v282_v30 = vrot.slane %v281_v28, 2  ;;  %v287_v31 = vrot.slane %v286_v29, 4  ;;  %v668_v32 = vpop.f32.mrb[4].mxu0 }
 0x104   :  { %v268_v33 = vsel %vm1021_vm6, %v668_v32, -inf  ;;  %v189_v34 = vpop.f32.mrb[5].mxu0 }
 0x105   :  { %v283_v35 = vmax.f32 %v281_v28, %v282_v30  ;;  %v288_v36 = vmax.f32 %v286_v29, %v287_v31  ;;  %v293_v37 = vmax.f32 %v189_v34, %v268_v33 }
 0x107   :  { %v284_v38 = vrot.slane %v283_v35, 1  ;;  %v289_v39 = vrot.slane %v288_v36, 2  ;;  %v294_v40 = vrot.slane %v293_v37, 4  ;;  %v671_v41 = vpop.f32.mrb[6].mxu0 }
 0x108   :  { %v270_v42 = vsel %vm1021_vm6, %v671_v41, -inf  ;;  %v199_v43 = vpop.f32.mrb[7].mxu0 }
 0x109   :  { %v290_v44 = vmax.f32 %v288_v36, %v289_v39  ;;  %v295_v45 = vmax.f32 %v293_v37, %v294_v40  ;;  %v300_v46 = vmax.f32 %v199_v43, %v270_v42  ;;  %v285_v47 = vmax.f32 %v283_v35, %v284_v38 }
 0x10b   :  { %v291_v48 = vrot.slane %v290_v44, 1  ;;  %v296_v49 = vrot.slane %v295_v45, 2  ;;  %v301_v50 = vrot.slane %v300_v46, 4  ;;  %v674_v51 = vpop.f32.mrb[8].mxu0  ;;  %v335_v58 = vmax.f32 %v285_v47, 0.0 }
 0x10c   :  { %v272_v52 = vsel %vm1021_vm6, %v674_v51, -inf  ;;  %v209_v53 = vpop.f32.mrb[9].mxu0  ;;  %v472_v51 = vld [vmem:[#allocation2 + $0xf8] sm:$0xff] }
 0x10d   :  { %v292_v54 = vmax.f32 %v290_v44, %v291_v48  ;;  %v297_v55 = vmax.f32 %v295_v45, %v296_v49  ;;  %v302_v56 = vmax.f32 %v300_v46, %v301_v50  ;;  %v307_v57 = vmax.f32 %v209_v53, %v272_v52  ;;  %v473_v52 = vld [vmem:[#allocation2 + $0x100] sm:$0xff] }
 0x10e   :  { %v816_v53 = vpack.c.bf16 %v473_v52, %v472_v51 }
 0x10f   :  { %v336_v59 = vmax.f32 %v292_v54, 0.0  ;;  %v298_v60 = vrot.slane %v297_v55, 1  ;;  %v303_v61 = vrot.slane %v302_v56, 2  ;;  %v308_v62 = vrot.slane %v307_v57, 4  ;;  %v677_v63 = vpop.f32.mrb[10].mxu0 }
 0x110   :  { %v274_v0 = vsel %vm1021_vm6, %v677_v63, -inf  ;;  %v219_v1 = vpop.f32.mrb[11].mxu0  ;;  %817 = vmatpush3.bf16.msra.mxu0 %v816_v53  ;;  %v581_v54 = vld [vmem:[#allocation2 + $0x80] ss:$0 sm:$0xff] }
 0x111   :  { %v373_v2 = vsel %vm372_vm7, %v336_v59, %v335_v58  ;;  %v299_v3 = vmax.f32 %v297_v55, %v298_v60  ;;  %v304_v4 = vmax.f32 %v302_v56, %v303_v61  ;;  %v309_v5 = vmax.f32 %v307_v57, %v308_v62  ;;  %v582_v59 = vld [vmem:[#allocation2 + $0x108] ss:$0 sm:$0xff] }
 0x112   :  { %v314_v6 = vmax.f32 %v219_v1, %v274_v0 }
 0x113   :  { %v337_v7 = vmax.f32 %v299_v3, 0.0  ;;  %v305_v8 = vrot.slane %v304_v4, 1  ;;  %v310_v9 = vrot.slane %v309_v5, 2  ;;  %v680_v10 = vpop.f32.mrb[12].mxu0 }
 0x114   :  { %v315_v11 = vrot.slane %v314_v6, 4  ;;  %v276_v12 = vsel %vm1021_vm6, %v680_v10, -inf  ;;  %v229_v13 = vpop.f32.mrb[13].mxu0 }
 0x115   :  { %v375_v14 = vsel %vm374_vm8, %v337_v7, %v373_v2  ;;  %v306_v15 = vmax.f32 %v304_v4, %v305_v8  ;;  %v311_v16 = vmax.f32 %v309_v5, %v310_v9  ;;  %v321_v17 = vmax.f32 %v229_v13, %v276_v12 }
 0x116   :  { %v316_v18 = vmax.f32 %v314_v6, %v315_v11 }
 0x117   :  { %v338_v20 = vmax.f32 %v306_v15, 0.0  ;;  %v312_v21 = vrot.slane %v311_v16, 1  ;;  %v322_v22 = vrot.slane %v321_v17, 4  ;;  %v683_v23 = vpop.f32.mrb[14].mxu0 }
 0x118   :  { %v317_v24 = vrot.slane %v316_v18, 2  ;;  %v278_v25 = vsel %vm1021_vm6, %v683_v23, -inf  ;;  %v239_v26 = vpop.f32.mrb[15].mxu0 }
 0x119   :  { %v313_v27 = vmax.f32 %v311_v16, %v312_v21  ;;  %v323_v28 = vmax.f32 %v321_v17, %v322_v22  ;;  %v328_v29 = vmax.f32 %v239_v26, %v278_v25  ;;  %v377_v30 = vsel %vm376_vm9, %v338_v20, %v375_v14 }
 0x11a   :  { %v318_v31 = vmax.f32 %v316_v18, %v317_v24 }
 0x11b   :  { %v339_v32 = vmax.f32 %v313_v27, 0.0  ;;  %v324_v33 = vrot.slane %v323_v28, 2  ;;  %v329_v34 = vrot.slane %v328_v29, 4 }
 0x11c   :  { %v319_v35 = vrot.slane %v318_v31, 1 }
 0x11d   :  { %v325_v36 = vmax.f32 %v323_v28, %v324_v33  ;;  %v330_v37 = vmax.f32 %v328_v29, %v329_v34  ;;  %v379_v38 = vsel %vm378_vm10, %v339_v32, %v377_v30 }
 0x11e   :  { %v320_v39 = vmax.f32 %v318_v31, %v319_v35 }
 0x11f   :  { %v326_v40 = vrot.slane %v325_v36, 1  ;;  %v331_v41 = vrot.slane %v330_v37, 2 }
 0x120   :  { %v340_v19 = vmax.f32 %v320_v39, 0.0 }
 0x121   :  { %v327_v42 = vmax.f32 %v325_v36, %v326_v40  ;;  %v332_v43 = vmax.f32 %v330_v37, %v331_v41 }
 0x122   :  { %v381_v44 = vsel %vm380_vm11, %v340_v19, %v379_v38 }
 0x123   :  { %v341_v45 = vmax.f32 %v327_v42, 0.0  ;;  %v333_v46 = vrot.slane %v332_v43, 1 }
 0x125   :  { %v334_v47 = vmax.f32 %v332_v43, %v333_v46  ;;  %v383_v48 = vsel %vm382_vm12, %v341_v45, %v381_v44 }
 0x127   :  { %v342_v49 = vmax.f32 %v334_v47, 0.0 }
 0x129   :  { %v385_v50 = vsel %vm384_vm13, %v342_v49, %v383_v48 }
 0x12a   :  { %717 = vmatmul.mubr.f32.vlgmr.msra.gmra.mrb[0].mxu1 %v385_v50 }
 0x1fd   :  { %v453_v55 = vpop.f32.mrb[0].mxu1 }
 0x1fe   :  { %v454_v56 = vadd.f32 %v581_v54, %v453_v55  ;;  %v718_v57 = vpop.f32.mrb[1].mxu1 }
 0x200   :  { %v457_v58 = vmax.f32 %v454_v56, 0.0 }
 0x202   :  { %752 = vmatmul.mubr.f32.vlgmr.msra.gmra.mrb[16].mxu0 %v457_v58 }
 0x2d5   :  { %v545_v60 = vpop.f32.mrb[16].mxu0 }
 0x2d6   :  { %v546_v61 = vadd.f32 %v582_v59, %v545_v60  ;;  %v753_v62 = vpop.f32.mrb[17].mxu0 }
 0x2d8   :  { %549 = vst [vmem:[#allocation5] sm:$0xff] %v546_v61 }
 0x2d9   :  { %859 = shalt.err (!%p856_p12)
}
 0x2da   :  { %s860_s23 = scalar_lea.hbm %s1056_s3, 128 }
 0x2db   :  { %p861_p13 = scmp.ne.s32.totalorder %s1056_s3, %s860_s23  ;;  %p864_p0 = scmp.lt.u32.totalorder %s860_s23, %s1056_s3 }
 0x2dd   :  { %p866_p1 = pnand %p864_p0, %p861_p13 }
 0x2df   :  { %869 = shalt.err (!%p866_p1)
}
 0x2e0   :  { %559 = dma.vmem_to_hbm [thread:$0]  %s557_s19, 128, %s1056_s3, [#allocation4]  }
 0x2e1   :  { %872 = dma.done.wait [#allocation4], 128  }
 0x2e2   :  { %873 = vsyncadd [#allocation4], 4294967168 }
 0x2e3   :  { %563 = vsyncpa [#allocation3], 1 }
 0x2e4   :  { %564 = vsyncpa [#allocation4], 1 }

</bundles_post_ra>
